<compile_context>
chip_gen: v6e
topology: v6e:2x2x1
jax: 0.10.0
libtpu: 0.0.40
codegen_flags: <defaults>
</compile_context>

<pallas_src>
import functools

import jax
import jax.numpy as jnp
from jax.experimental import pallas as pl
from jax.experimental.pallas import tpu as pltpu


def _round_up(n: int, m: int) -> int:
    return ((n + m - 1) // m) * m


def _cheby_kan_kernel(x_ref, c_ref, b_ref, o_ref, *, num_degrees, in_features,
                      fuse):
    """x_ref: (TB, I) input tile.
       c_ref: (D*I, TO) bf16 packed coeff, degree-major, degrees 1..D.
       b_ref: (1, TO) f32 degree-0 bias (= sum_i coeff[i, :, 0]).
       o_ref: (TB, TO) output tile."""
    z = jnp.tanh(x_ref[...].astype(jnp.float32))          # (TB, I) f32 on VPU/EUP

    # Chebyshev recurrence T_1..T_D in f32 (== cos(d*acos(z)) for |z| < 1).
    t_prev = jnp.ones_like(z)                             # T_0
    t_curr = z                                            # T_1
    terms = [t_curr]
    for _ in range(2, num_degrees):
        t_next = 2.0 * z * t_curr - t_prev
        terms.append(t_next)
        t_prev, t_curr = t_curr, t_next

    if fuse:
        # One deep MXU matmul with K = D*I instead of D shallow K=I dots.
        basis = jnp.concatenate(terms, axis=-1).astype(jnp.bfloat16)  # (TB, D*I)
        acc = jnp.dot(basis, c_ref[...], preferred_element_type=jnp.float32)
    else:
        acc = jnp.zeros(o_ref.shape, jnp.float32)
        for d, t in enumerate(terms):
            acc += jnp.dot(
                t.astype(jnp.bfloat16),
                c_ref[d * in_features:(d + 1) * in_features, :],
                preferred_element_type=jnp.float32)

    o_ref[...] = (acc + b_ref[...]).astype(o_ref.dtype)


def prepare_cheby_params(cheby_coeff, *, lane=128):
    """One-time parameter packing (do at init, NOT per forward call):
         coeff (I, O, D+1) -> (D*I, O_pad) bf16 (degrees 1..D, degree-major)
                            + (1, O_pad) f32 bias for degree 0."""
    in_features, out_features, dp1 = cheby_coeff.shape
    o_pad = max(lane, _round_up(out_features, lane))
    coeff = cheby_coeff.astype(jnp.float32)

    # Degree-0 basis is identically 1 -> pure bias term, kept in f32.
    bias = jnp.sum(coeff[:, :, 0], axis=0)                            # (O,)
    bias = jnp.pad(bias, (0, o_pad - out_features)).reshape(1, o_pad)

    n_deg = dp1 - 1
    if n_deg > 0:
        w = jnp.transpose(coeff[:, :, 1:], (2, 0, 1))                 # (D, I, O)
        w = jnp.pad(w, ((0, 0), (0, 0), (0, o_pad - out_features)))
        w = w.reshape(n_deg * in_features, o_pad).astype(jnp.bfloat16)
    else:
        w = jnp.zeros((0, o_pad), jnp.bfloat16)
    return w, bias


def cheby_kan_forward(x, coeff_packed, bias, *, in_features, out_features,
                      block_b=None, block_o=None):
    """x: (..., in_features).  coeff_packed/bias from prepare_cheby_params."""
    x = x.reshape(-1, in_features).astype(jnp.float32)
    batch = x.shape[0]
    k_total, o_pad = coeff_packed.shape
    n_deg = k_total // in_features if in_features else 0
    num_degrees = n_deg + 1

    if n_deg == 0:
        # spline_order == 0: output is just the degree-0 bias.
        y = jnp.broadcast_to(bias[:, :out_features], (batch, out_features))
        return y.astype(jnp.float32)

    # Tile sizes: batch tile multiple of 8, lane-dense output tile mult. of 128.
    if block_b is None:
        block_b = 128
    tb = min(_round_up(block_b, 8), _round_up(batch, 8))
    if block_o is None:
        block_o = 256
    to = min(_round_up(block_o, 128), o_pad)
    if o_pad % to:
        to = 128

    b_pad = _round_up(batch, tb)
    if b_pad != batch:
        x = jnp.pad(x, ((0, b_pad - batch), (0, 0)))

    # Fuse all degrees into one matmul when the basis slab is small enough;
    # otherwise fall back to per-degree dots on slices of the packed weight.
    fuse = k_total <= 1024

    kernel = functools.partial(_cheby_kan_kernel, num_degrees=num_degrees,
                               in_features=in_features, fuse=fuse)

    y_pad = pl.pallas_call(
        kernel,
        out_shape=jax.ShapeDtypeStruct((b_pad, o_pad), jnp.float32),
        grid=(o_pad // to, b_pad // tb),          # out-tiles outer, batch inner
        in_specs=[
            pl.BlockSpec((tb, in_features), lambda jo, jb: (jb, 0)),
            pl.BlockSpec((k_total, to), lambda jo, jb: (0, jo)),  # resident coeff
            pl.BlockSpec((1, to), lambda jo, jb: (0, jo)),        # degree-0 bias
        ],
        out_specs=pl.BlockSpec((tb, to), lambda jo, jb: (jb, jo)),
        compiler_params=pltpu.CompilerParams(
            dimension_semantics=("parallel", "parallel")),
    )(x, coeff_packed, bias)

    return y_pad[:batch, :out_features]


def cheby_kan_reference(x, cheby_coeff):
    """Pure-JAX reference mirroring the PyTorch forward literally."""
    in_features, out_features, dp1 = cheby_coeff.shape
    arange = jnp.arange(0, dp1, dtype=jnp.float32)
    z = jnp.tanh(x).reshape(-1, in_features, 1)
    z = jnp.broadcast_to(z, (z.shape[0], in_features, dp1))
    z = jnp.cos(jnp.arccos(z) * arange)
    y = jnp.einsum("bid,iod->bo", z, cheby_coeff)
    return y.reshape(-1, out_features)


if __name__ == "__main__":
    # Module hyper-parameters (small, consistent with the forward pass).
    batch = 32
    in_features = 32
    out_features = 16
    spline_order = 3

    key = jax.random.PRNGKey(0)
    k_x, k_c = jax.random.split(key)

    # nn.init.normal_(mean=0, std=1/(in_features*(spline_order+1)))
    std = 1.0 / (in_features * (spline_order + 1))
    cheby_coeff = std * jax.random.normal(
        k_c, (in_features, out_features, spline_order + 1), dtype=jnp.float32)
    x = jax.random.normal(k_x, (batch, in_features), dtype=jnp.float32)

    # One-time weight packing (transpose / degree-0 bias fold / bf16 / pad).
    coeff_packed, bias = prepare_cheby_params(cheby_coeff)

    # Small batch tile so the demo exercises a multi-step pipelined grid.
    fwd = jax.jit(functools.partial(
        cheby_kan_forward, in_features=in_features, out_features=out_features,
        block_b=16))

    y = jax.block_until_ready(fwd(x, coeff_packed, bias))

    y_ref = cheby_kan_reference(x, cheby_coeff)
    assert y.shape == (batch, out_features)
    err = jnp.max(jnp.abs(y - y_ref))
    # bf16 MXU operands with f32 accumulation -> looser tolerance than pure f32.
    assert jnp.allclose(y, y_ref, atol=2e-3, rtol=2e-2), f"max abs err {err}"

    print("KERNEL_OK")
</pallas_src>

<mosaic_0001>
module attributes {stable_mosaic.version = 11 : i64} {
  func.func @_cheby_kan_kernel(%arg0: i32, %arg1: i32, %arg2: memref<16x32xf32, #tpu.memory_space<vmem>>, %arg3: memref<96x128xbf16, #tpu.memory_space<vmem>>, %arg4: memref<1x128xf32, #tpu.memory_space<vmem>>, %arg5: memref<16x128xf32, #tpu.memory_space<vmem>>) attributes {dimension_semantics = [#tpu.dimension_semantics<parallel>, #tpu.dimension_semantics<parallel>], iteration_bounds = array<i64: 1, 2>, scalar_prefetch = 0 : i64, scratch_operands = 0 : i64, tpu.core_type = #tpu.core_type<tc>, window_params = [{transform_indices = @transform_0, window_bounds = array<i64: 16, 32>}, {transform_indices = @transform_1, window_bounds = array<i64: 96, 128>}, {transform_indices = @transform_2, window_bounds = array<i64: 1, 128>}, {transform_indices = @transform_3, window_bounds = array<i64: 16, 128>}]} {
    %c0 = arith.constant 0 : index
    %c0_0 = arith.constant 0 : index
    %0 = vector.load %arg2[%c0, %c0_0] : memref<16x32xf32, #tpu.memory_space<vmem>>, vector<16x32xf32>
    %1 = math.tanh %0 : vector<16x32xf32>
    %cst = arith.constant 1.000000e+00 : f32
    %2 = vector.broadcast %cst : f32 to vector<16x32xf32>
    %cst_1 = arith.constant 2.000000e+00 : f32
    %3 = vector.broadcast %cst_1 : f32 to vector<16x32xf32>
    %4 = arith.mulf %3, %1 : vector<16x32xf32>
    %5 = arith.mulf %4, %1 : vector<16x32xf32>
    %6 = arith.subf %5, %2 : vector<16x32xf32>
    %cst_2 = arith.constant 2.000000e+00 : f32
    %7 = vector.broadcast %cst_2 : f32 to vector<16x32xf32>
    %8 = arith.mulf %7, %1 : vector<16x32xf32>
    %9 = arith.mulf %8, %6 : vector<16x32xf32>
    %10 = arith.subf %9, %1 : vector<16x32xf32>
    %11 = tpu.concatenate %1, %6, %10 in 1 : vector<16x32xf32>, vector<16x32xf32>, vector<16x32xf32> -> vector<16x96xf32>
    %12 = arith.truncf %11 : vector<16x96xf32> to vector<16x96xbf16>
    %c0_3 = arith.constant 0 : index
    %c0_4 = arith.constant 0 : index
    %13 = vector.load %arg3[%c0_3, %c0_4] : memref<96x128xbf16, #tpu.memory_space<vmem>>, vector<96x128xbf16>
    %cst_5 = arith.constant dense<0.000000e+00> : vector<16x128xf32>
    %14 = tpu.matmul %12, %13, %cst_5 {dimension_numbers = #tpu.dot_dimension_numbers<[1], [0], [0], [1], [0, 0, 1, 1], [], []>} : vector<16x96xbf16>, vector<96x128xbf16>, vector<16x128xf32> -> vector<16x128xf32>
    %c0_6 = arith.constant 0 : index
    %c0_7 = arith.constant 0 : index
    %15 = vector.load %arg4[%c0_6, %c0_7] : memref<1x128xf32, #tpu.memory_space<vmem>>, vector<1x128xf32>
    %16 = vector.broadcast %15 : vector<1x128xf32> to vector<16x128xf32>
    %17 = arith.addf %14, %16 : vector<16x128xf32>
    %c0_8 = arith.constant 0 : index
    %c0_9 = arith.constant 0 : index
    %18 = vector.load %arg5[%c0_8, %c0_9] : memref<16x128xf32, #tpu.memory_space<vmem>>, vector<16x128xf32>
    tpu.vector_store %arg5[%c0_8, %c0_9], %17 {strides = array<i32>} : memref<16x128xf32, #tpu.memory_space<vmem>>, vector<16x128xf32>,
    return
  }
  func.func @transform_0(%arg0: i32, %arg1: i32) -> (i32, i32) {
    %c0_i32 = arith.constant 0 : i32
    %c0_i32_0 = arith.constant 0 : i32
    return %arg1, %c0_i32 : i32, i32
  }
  func.func @transform_1(%arg0: i32, %arg1: i32) -> (i32, i32) {
    %c0_i32 = arith.constant 0 : i32
    %c0_i32_0 = arith.constant 0 : i32
    return %c0_i32, %arg0 : i32, i32
  }
  func.func @transform_2(%arg0: i32, %arg1: i32) -> (i32, i32) {
    %c0_i32 = arith.constant 0 : i32
    %c0_i32_0 = arith.constant 0 : i32
    return %c0_i32, %arg0 : i32, i32
  }
  func.func @transform_3(%arg0: i32, %arg1: i32) -> (i32, i32) {
    %c0_i32 = arith.constant 0 : i32
    return %arg1, %arg0 : i32, i32
  }
}

</mosaic_0001>

<bundles_post_ra>
// kernel: cheby_kan_forward.1
= control target key start
LH: loop header
LB: loop body
LE: loop exit
PB: predicated region body
PF: predicated region fallthrough
CT: control target
= control target key end

     0   :  { %8 = vsyncpa [#allocation3], 0  ;;  %s906_s0 = inlined_call_operand.hbm [shape: f32[32,32], index: 0, kind: input, shape index: {}]   ;;  %s907_s1 = inlined_call_operand.hbm [shape: bf16[96,128], index: 1, kind: input, shape index: {}]   ;;  %s908_s2 = inlined_call_operand.vmem [shape: f32[1,128], index: 2, kind: input, shape index: {}]   ;;  %s909_s3 = inlined_call_operand.vmem [shape: f32[32,128], index: 3, kind: output, shape index: {}]  }
   0x1   :  { %10 = vsyncpa [#allocation3 + $0x1], 0 }
   0x2   :  { %11 = vsyncpa [#allocation5], 0  ;;  %s783_s12 = smov 0   ;;  %s785_s13 = smov 0  }
   0x3   :  { %s787_s14 = smov 0   ;;  %s789_s15 = smov 0  }
   0x4   :  { %s791_s16 = smov 0   ;;  %s793_s17 = smov 0  }
   0x5 LB: > { %s499_s18 = sadd.s32 4294967295, %s751_s17   ;;  %p49_p0 = scmp.ne.s32.totalorder %s735_s13, %s731_s12  ;;  %s751_s17 = sphi %s793_s17, %s17_s17   ;;  %s747_s16 = sphi %s791_s16, %s919_s16   ;;  %s743_s15 = sphi %s789_s15, %s918_s15   ;;  %s739_s14 = sphi %s787_s14, %s917_s14   ;;  %s735_s13 = sphi %s785_s13, %s916_s13   ;;  %s731_s12 = sphi %s783_s12, %s915_s12  }
   0x6   : > { %p813_p1 = scmp.eq.s32.totalorder %s499_s18, 0  ;;  %p501_p2 = scmp.ge.s32.totalorder %s751_s17, 1 }
   0x7   : > { %p140_p3 = scmp.lt.s32.totalorder %s751_s17, 3  ;;  %s753_s22 = smov [#allocation4]  }
   0x8   : > { %p821_p4 = por %p813_p1, %p49_p0  ;;  %s154_s23 = sshll.u32 %s753_s22, 4  ;;  %s155_s23 = int_to_ptr.vmem [resolvable:$true] %s154_s23 }
   0x9   : > { %p825_p5 = pnand %p501_p2, %p140_p3  ;;  %s26_s25 = sadd.s32 1, %s747_s16 }
   0xa   : > { %s654_s26 = scalar_lea.vmem %s155_s23, 768  ;;  %p662_p12 = scmp.lt.s32.totalorder %s155_s23, %s155_s23 }
   0xb   : > { %p555_p6 = pneg %p825_p5  ;;  %p655_p9 = scmp.ne.s32.totalorder %s155_s23, %s654_s26 }
   0xc   : > { %p663_p13 = scmp.lt.s32.totalorder %s654_s26, %s654_s26 }
   0xd   : > { %p833_p7 = pnand %p555_p6, %p813_p1 }
   0xe   : > { %p664_p0 = por %p663_p13, %p662_p12 }
   0xf   : > { %p645_p8 = pneg %p833_p7 }
  0x11   : > { %p657_p10 = pnand %p655_p9, %p645_p8 }
  0x13   : > { %p658_p11 = pneg %p657_p10 }
  0x15   : > { %p665_p2 = pnand %p664_p0, %p658_p11 }
  0x17   : > { %668 = shalt.err (!%p665_p2)
}
  0x18   : > { %s754_s27 = smov 64   ;;  %s755_s28 = smov 4  }
  0x19   : > { %558 = dma.hbm_to_vmem [thread:$0]  (!%p833_p7), %s907_s1, 768, %s155_s23, [#allocation5], %s754_s27, %s754_s27, %s755_s28  }
  0x1a   : > { %p27_p3 = scmp.ge.s32.totalorder %s26_s25, 2  ;;  %s36_s4 = sadd.s32 1, %s739_s14 }
  0x1b   : > { %p43_p6 = scmp.ne.s32.totalorder %s739_s14, %s735_s13  ;;  %p44_p8 = scmp.eq.s32.totalorder %s751_s17, 0 }
  0x1c   : > { %s921_s25 = smov (%p27_p3, %s26_s25), 0  ;;  %p564_p10 = scmp.lt.s32.totalorder %s751_s17, 2 }
  0x1d   : > { %p45_p9 = por %p44_p8, %p43_p6  ;;  %s33_s5 = ssub.s32 %s747_s16, %s921_s25 }
  0x1e   : > { %s174_s6 = sand.u32 1, %s739_s14   ;;  %p34_p11 = scmp.eq.s32.totalorder %s33_s5, 0 }
  0x1f   : > { %s505_s7 = sshll.u32 %s174_s6, 4  ;;  %s525_s8 = sshll.u32 %s747_s16, 8 }
  0x20   : > { %s857_s9 = scalar_select %p34_p11, %s739_s14, %s36_s4  }
  0x21   : > { %s184_s12 = scalar_lea.hbm %s906_s0, %s525_s8  ;;  %s178_s18 = scalar_lea.vmem [#allocation2], %s505_s7 }
  0x22   : > { %s185_s22 = sshll.u32 %s178_s18, 4  ;;  %p862_p7 = pnand %p564_p10, %p45_p9  ;;  %s186_s22 = int_to_ptr.vmem [resolvable:$true] %s185_s22 }
  0x23   : > { %s175_s24 = scalar_lea.sflag [#allocation3], %s174_s6  ;;  %s682_s26 = scalar_lea.vmem %s186_s22, 256 }
  0x24   : > { %p671_p12 = pneg %p862_p7  ;;  %p683_p13 = scmp.ne.s32.totalorder %s186_s22, %s682_s26 }
  0x25   : > { %s756_s27 = smov [#allocation2]  }
  0x26   : > { %p685_p0 = pnand %p683_p13, %p671_p12  ;;  %s687_s28 = sshll.u32 %s756_s27, 4  ;;  %s688_s28 = int_to_ptr.vmem [resolvable:$false] %s687_s28 }
  0x27   : > { %s689_s29 = scalar_lea.vmem %s688_s28, 512  ;;  %p690_p3 = scmp.lt.s32.totalorder %s186_s22, %s688_s28 }
  0x28   : > { %p686_p2 = pneg %p685_p0  ;;  %p691_p6 = scmp.lt.s32.totalorder %s689_s29, %s682_s26 }
  0x2a   : > { %p692_p8 = por %p691_p6, %p690_p3 }
  0x2c   : > { %p693_p9 = pnand %p692_p8, %p686_p2 }
  0x2e   : > { %696 = shalt.err (!%p693_p9)
}
  0x2f   : > { %s757_s30 = smov 128   ;;  %s758_s4 = smov 8  }
  0x30   : > { %562 = dma.hbm_to_vmem [thread:$0]  (!%p862_p7), %s184_s12, 256, %s186_s22, %s175_s24, %s757_s30, %s757_s30, %s758_s4  }
  0x31   : > { %197 = sbr.rel (%p825_p5) target bundleno = 405 (0x195), region = 32  ;;  %s199_s5 = sand.u32 (!%p825_p5), 1, %s735_s13  }
  0x32   : > { %s509_s6 = sshll.u32 (!%p825_p5), %s199_s5, 4  ;;  %s200_s7 = scalar_lea.sflag (!%p825_p5), [#allocation3], %s199_s5 }
  0x33   : > { %s203_s8 = scalar_lea.vmem (!%p825_p5), [#allocation2], %s509_s6 }
  0x36   : > { %722 = dma.done.wait (%p821_p4), %s200_s7, 256  }
  0x37   : > { %724 = vsyncadd (%p821_p4), %s200_s7, 4294967040 }
  0x38   : > { %726 = dma.done.wait (%p813_p1), [#allocation5], 768  }
  0x39   : > { %728 = vsyncadd (%p813_p1), [#allocation5], 4294966528  ;;  %v759_v0 = vmov 0.0   ;;  %v250_v1 = vld [vmem:[%s203_s8] sm:$0xff]  ;;  %v251_v2 = vld [vmem:[%s203_s8 + $0x8] sm:$0xff]  ;;  %vm760_vm0 = vmmov 0  }
  0x3a   : > { %533 = vmatprep.subr.bf16.mxu0 %v759_v0  ;;  %639 = vtanh.f32 %v250_v1  ;;  %v633_v3 = vld [vmem:[#allocation4 + $0x28] sm:$0xff]   ;;  %v634_v4 = vld [vmem:[#allocation4 + $0x20] sm:$0xff]   ;;  %v635_v5 = vld [vmem:[#allocation4 + $0x18] sm:$0xff]   ;;  %545 = vmatprep.mubr.msk.bf16.mxu0 %vm760_vm0, %v759_v0  ;;  %s761_s19 = smov 32   ;;  %s762_s20 = smov 64   ;;  %vm280_vm1 = vcmask 261120  }
  0x3b   : > { %641 = vtanh.f32 %v251_v2  ;;  %534 = vmatpush3.bf16.msra.mxu0 %v633_v3  ;;  %v636_v6 = vld [vmem:[#allocation4 + $0x10] sm:$0xff]   ;;  %v637_v10 = vld [vmem:[#allocation4 + $0x8] sm:$0xff]   ;;  %v638_v15 = vld [vmem:[#allocation4] sm:$0xff]   ;;  %vm283_vm2 = vcmask 523264   ;;  %vm342_vm3 = vcmask 785408   ;;  %s511_s21 = sshll.u32 %s743_s15, 1 }
  0x3c   : > { %535 = vmatprep.subr.bf16.mxu0 %v759_v0  ;;  %p241_p1 = scmp.lt.s32.totalorder %s511_s21, 3  ;;  %v515_v34 = vld [vmem:[%s908_s2] ss:$0 sm:$0xff] }
  0x3e   : > { %s923_s21 = smov (!%p241_p1, %s511_s21), 3 }
  0x3f   : > { %536 = vmatpush3.bf16.msra.mxu0 %v634_v4  ;;  %s512_s10 = sshll.u32 %s923_s21, 3 }
  0x40   : > { %537 = vmatprep.subr.bf16.mxu0 %v759_v0  ;;  %s247_s23 = scalar_lea.vmem %s909_s3, %s512_s10 }
  0x43   : > { %538 = vmatpush3.bf16.msra.mxu0 %v635_v5 }
  0x44   : > { %539 = vmatprep.subr.bf16.mxu0 %v759_v0 }
  0x47   : > { %v640_v7 = vpop.eup %639  ;;  %540 = vmatpush3.bf16.msra.mxu0 %v636_v6 }
  0x48   : > { %v642_v8 = vpop.eup %641  ;;  %v254_v9 = vmul.f32 2.0, %v640_v7  ;;  %541 = vmatprep.subr.bf16.mxu0 %v759_v0 }
  0x49   : > { %v255_v11 = vmul.f32 2.0, %v642_v8 }
  0x4a   : > { %v256_v12 = vmul.f32 %v640_v7, %v254_v9 }
  0x4b   : > { %v257_v13 = vmul.f32 %v642_v8, %v255_v11  ;;  %542 = vmatpush3.bf16.msra.mxu0 %v637_v10 }
  0x4c   : > { %v513_v14 = vadd.f32 -1.0, %v256_v12  ;;  %543 = vmatprep.subr.bf16.mxu0 %v759_v0 }
  0x4d   : > { %v514_v16 = vadd.f32 -1.0, %v257_v13 }
  0x4e   : > { %v260_v17 = vmul.f32 %v513_v14, %v254_v9 }
  0x4f   : > { %v261_v18 = vmul.f32 %v514_v16, %v255_v11  ;;  %v623_v19 = vpack.i.bf16 %v514_v16, %v513_v14  ;;  %544 = vmatpush3.bf16.msra.mxu0 %v638_v15 }
  0x50   : > { %v262_v20 = vsub.f32 %v260_v17, %v640_v7 }
  0x51   : > { %624 = vrot.lane.b32.xlu0 %v623_v19, %s761_s19  ;;  %v263_v21 = vsub.f32 %v261_v18, %v642_v8 }
  0x53   : > { %v628_v22 = vpack.i.bf16 %v263_v21, %v262_v20 }
  0x55   : > { %629 = vrot.lane.b32.xlu0 %v628_v22, %s762_s20 }
  0xc3   : > { %v625_v23 = vpop.permute.xlu0 %624 }
  0xc4   : > { %v627_v24 = vunpack.i.h.bf16 %v625_v23  ;;  %v626_v25 = vunpack.i.l.bf16 %v625_v23 }
  0xc6   : > { %v282_v29 = vsel %vm280_vm1, %v642_v8, %v627_v24  ;;  %v281_v30 = vsel %vm280_vm1, %v640_v7, %v626_v25 }
  0xc7   : > { %v630_v26 = vpop.permute.xlu0 %629 }
  0xc8   : > { %v632_v27 = vunpack.i.h.bf16 %v630_v26  ;;  %v631_v28 = vunpack.i.l.bf16 %v630_v26 }
  0xca   : > { %v285_v31 = vsel %vm283_vm2, %v282_v29, %v632_v27  ;;  %v284_v32 = vsel %vm283_vm2, %v281_v30, %v631_v28 }
  0xcb   : > { %v286_v33 = vpack.c.bf16 %v285_v31, %v284_v32 }
  0xcd   : > { %546 = vmatmul.mubr.msk.bf16.vlgmr.msra.gmra.mxu0 %vm342_vm3, %v286_v33 }
 0x18d   : > { %v380_v35 = vpop.f32.mrf.mxu0 }
 0x18e   : > { %v381_v36 = vadd.f32 %v515_v34, %v380_v35 }
 0x18f   : > { %v547_v37 = vpop.f32.mrf.mxu0 }
 0x190   : > { %387 = vst [vmem:[%s247_s23] sm:$0xff] %v381_v36 }
 0x191   : > { %v383_v38 = vpop.f32.mrf.mxu0 }
 0x192   : > { %v384_v39 = vadd.f32 %v515_v34, %v383_v38 }
 0x193   : > { %v548_v40 = vpop.f32.mrf.mxu0 }
 0x194   : > { %388 = vst [vmem:[%s247_s23 + $0x8] sm:$0xff] %v384_v39 }
 0x195 PF: > { %s17_s17 = sadd.s32 1, %s751_s17   ;;  %s915_s12 = smov %s735_s13 }
 0x196   : > { %p14_p4 = scmp.ge.s32.totalorder %s17_s17, 4   ;;  %s916_s13 = smov %s739_s14 }
 0x197   : > { %s917_s14 = smov %s857_s9  ;;  %s918_s15 = smov %s747_s16 }
 0x198   : > { %s919_s16 = smov %s921_s25  ;;  %16 = sbr.rel (!%p14_p4) target bundleno = 5 (0x5), region = 80 }
 0x19d   :  { %417 = vsyncpa [#allocation3], 1 }
 0x19e   :  { %419 = vsyncpa [#allocation3 + $0x1], 1 }
 0x19f   :  { %420 = vsyncpa [#allocation5], 1 }

</bundles_post_ra>
